<compile_context>
chip_gen: v7x
topology: tpu7x:2x2x1
jax: 0.10.0
libtpu: 0.0.40
codegen_flags: <defaults>
</compile_context>

<pallas_src>
import jax
import jax.numpy as jnp
from jax.experimental import pallas as pl
from jax.experimental.pallas import tpu as pltpu


# ----------------------------- Pallas kernel -------------------------------
def net_kernel(ids_ref,                              # (B,) int32, SMEM (scalar prefetch)
               x_cont_ref,                           # (TB, 300) VMEM
               emb_hbm_ref,                          # (vocab, emb_output) HBM (pl.ANY)
               we_ref, be_ref,                       # emb_nn Linear
               w1c_ref, w1x_ref, b1_ref,             # mlp layer 1 (split matmul)
               w2_ref, b2_ref,                       # mlp layer 2
               w3_ref, b3_ref,                       # head (w3 is (1, o1))
               out_ref,                              # (TB, 1)
               emb_buf, sem):                        # scratch: VMEM gather buf + DMA sem
    TB = out_ref.shape[0]
    base = pl.program_id(0) * TB

    # ---- fused nn.Embedding gather: one small row DMA per batch row --------
    @pl.loop(0, TB)
    def _start(r):
        idx = ids_ref[base + r]
        pltpu.make_async_copy(emb_hbm_ref.at[pl.ds(idx, 1), :],
                              emb_buf.at[pl.ds(r, 1), :],
                              sem.at[0]).start()

    @pl.loop(0, TB)
    def _wait(r):
        # Same byte count per copy; TB waits drain all TB row DMAs.
        pltpu.make_async_copy(emb_hbm_ref.at[pl.ds(0, 1), :],
                              emb_buf.at[pl.ds(0, 1), :],
                              sem.at[0]).wait()

    x_emb = emb_buf[...]                                            # (TB, emb_output)

    # emb_nn tail: Linear(emb_output -> cat_dim) + ReLU   (Dropout = identity)
    h_cat = jnp.maximum(
        jnp.dot(x_emb, we_ref[...], preferred_element_type=jnp.float32)
        + be_ref[...], 0.0)

    # mlp layer 1: Linear(cat_dim + 300 -> o0) + ReLU, concat folded into split matmul
    h1 = jnp.maximum(
        jnp.dot(h_cat, w1c_ref[...], preferred_element_type=jnp.float32)
        + jnp.dot(x_cont_ref[...], w1x_ref[...], preferred_element_type=jnp.float32)
        + b1_ref[...], 0.0)

    # mlp layer 2: Linear(o0 -> o1) + ReLU
    h2 = jnp.maximum(
        jnp.dot(h1, w2_ref[...], preferred_element_type=jnp.float32) + b2_ref[...], 0.0)

    # head: Linear(o1 -> 1) as VPU multiply + lane reduce (MXU would waste a push
    # for a single useful output column)
    out_ref[...] = jnp.sum(h2 * w3_ref[...], axis=-1, keepdims=True) + b3_ref[...]


# ------------------------------ wrapper ------------------------------------
def net_forward(x_cont, x_cat, params, *, batch_tile=128):
    (emb_table, we, be, w1c, w1x, b1, w2, b2, w3, b3) = params
    B, cont_dim = x_cont.shape
    emb_output = emb_table.shape[1]

    TB = batch_tile if (B % batch_tile == 0) else B
    assert B % TB == 0 and TB % 8 == 0, "batch must tile into multiples of 8 (f32 sublanes)"

    grid_spec = pltpu.PrefetchScalarGridSpec(
        num_scalar_prefetch=1,                       # x_cat -> SMEM, visible to index_maps
        grid=(B // TB,),
        in_specs=[
            pl.BlockSpec((TB, cont_dim), lambda i, ids: (i, 0)),   # x_cont, tiled over batch
            pl.BlockSpec(memory_space=pl.ANY),                      # emb_table stays in HBM
            pl.BlockSpec(we.shape,  lambda i, ids: (0, 0)),         # weights: VMEM-resident
            pl.BlockSpec(be.shape,  lambda i, ids: (0, 0)),
            pl.BlockSpec(w1c.shape, lambda i, ids: (0, 0)),
            pl.BlockSpec(w1x.shape, lambda i, ids: (0, 0)),
            pl.BlockSpec(b1.shape,  lambda i, ids: (0, 0)),
            pl.BlockSpec(w2.shape,  lambda i, ids: (0, 0)),
            pl.BlockSpec(b2.shape,  lambda i, ids: (0, 0)),
            pl.BlockSpec(w3.shape,  lambda i, ids: (0, 0)),
            pl.BlockSpec(b3.shape,  lambda i, ids: (0, 0)),
        ],
        out_specs=pl.BlockSpec((TB, 1), lambda i, ids: (i, 0)),
        scratch_shapes=[
            pltpu.VMEM((TB, emb_output), jnp.float32),   # gathered embedding rows
            pltpu.SemaphoreType.DMA((1,)),
        ],
    )

    return pl.pallas_call(
        net_kernel,
        out_shape=jax.ShapeDtypeStruct((B, 1), jnp.float32),
        grid_spec=grid_spec,
        compiler_params=pltpu.CompilerParams(
            dimension_semantics=("parallel",)),          # batch tiles shard across TCs (v7x)
    )(x_cat, x_cont, emb_table, we, be, w1c, w1x, b1, w2, b2, w3, b3)


# --------------------------- parameter setup --------------------------------
def init_params(key, *, cat_input_dim=3774, emb_output=32,
                cat_dims=(48,), output_dims=(64, 32), cont_dim=300):
    assert len(cat_dims) == 1 and len(output_dims) == 2, "small demo config"
    cat_dim = cat_dims[0]
    o0, o1 = output_dims
    ks = jax.random.split(key, 10)
    scale = 0.05
    emb_table = scale * jax.random.normal(ks[0], (cat_input_dim, emb_output), jnp.float32)
    we = scale * jax.random.normal(ks[1], (emb_output, cat_dim), jnp.float32)
    be = scale * jax.random.normal(ks[2], (1, cat_dim), jnp.float32)
    # W1 acts on concat([h_cat, x_cont]) = cat_dim + cont_dim features, stored split.
    w1c = scale * jax.random.normal(ks[3], (cat_dim, o0), jnp.float32)
    w1x = scale * jax.random.normal(ks[4], (cont_dim, o0), jnp.float32)
    b1 = scale * jax.random.normal(ks[5], (1, o0), jnp.float32)
    w2 = scale * jax.random.normal(ks[6], (o0, o1), jnp.float32)
    b2 = scale * jax.random.normal(ks[7], (1, o1), jnp.float32)
    w3 = scale * jax.random.normal(ks[8], (1, o1), jnp.float32)   # head as a row vector
    b3 = scale * jax.random.normal(ks[9], (1, 1), jnp.float32)
    return (emb_table, we, be, w1c, w1x, b1, w2, b2, w3, b3)


def reference_forward(x_cont, x_cat, params):
    """Pure-JAX reference mirroring the PyTorch forward (eval mode)."""
    (emb_table, we, be, w1c, w1x, b1, w2, b2, w3, b3) = params
    x_emb = jnp.take(emb_table, x_cat, axis=0)
    h_cat = jax.nn.relu(x_emb @ we + be)
    concat = jnp.concatenate([h_cat, x_cont], axis=1)
    w1 = jnp.concatenate([w1c, w1x], axis=0)
    h1 = jax.nn.relu(concat @ w1 + b1)
    h2 = jax.nn.relu(h1 @ w2 + b2)
    return h2 @ w3.T + b3


# --------------------------------- main --------------------------------------
if __name__ == "__main__":
    key = jax.random.PRNGKey(0)
    k_par, k_cont, k_cat = jax.random.split(key, 3)

    B = 256                                      # 2 grid steps of 128 rows each
    params = init_params(k_par)
    x_cont = jax.random.normal(k_cont, (B, 300), jnp.float32)    # continuous features
    x_cat = jax.random.randint(k_cat, (B,), 0, 3774, jnp.int32)  # categorical ids

    out = net_forward(x_cont, x_cat, params)
    out = jax.block_until_ready(out)

    ref = reference_forward(x_cont, x_cat, params)
    assert out.shape == (B, 1)
    assert jnp.allclose(out, ref, atol=1e-4, rtol=1e-4), "mismatch vs JAX reference"

    print("KERNEL_OK")
</pallas_src>

<mosaic_0001>
module attributes {stable_mosaic.version = 11 : i64} {
  func.func @net_kernel(%arg0: i32, %arg1: memref<256xi32, #tpu.memory_space<smem>>, %arg2: memref<128x300xf32, #tpu.memory_space<vmem>>, %arg3: memref<3774x32xf32, #tpu.memory_space<any>>, %arg4: memref<32x48xf32, #tpu.memory_space<vmem>>, %arg5: memref<1x48xf32, #tpu.memory_space<vmem>>, %arg6: memref<48x64xf32, #tpu.memory_space<vmem>>, %arg7: memref<300x64xf32, #tpu.memory_space<vmem>>, %arg8: memref<1x64xf32, #tpu.memory_space<vmem>>, %arg9: memref<64x32xf32, #tpu.memory_space<vmem>>, %arg10: memref<1x32xf32, #tpu.memory_space<vmem>>, %arg11: memref<1x32xf32, #tpu.memory_space<vmem>>, %arg12: memref<1x1xf32, #tpu.memory_space<vmem>>, %arg13: memref<128x1xf32, #tpu.memory_space<vmem>>, %arg14: memref<128x32xf32, #tpu.memory_space<vmem>>, %arg15: memref<1x!tpu.dma_semaphore, #tpu.memory_space<semaphore_mem>>) attributes {dimension_semantics = [#tpu.dimension_semantics<parallel>], iteration_bounds = array<i64: 2>, scalar_prefetch = 1 : i64, scratch_operands = 2 : i64, tpu.core_type = #tpu.core_type<tc>, window_params = [{transform_indices = @transform_0, window_bounds = array<i64: 128, 300>}, {}, {pipeline_mode = #tpu.pipeline_mode<synchronous>, transform_indices = @transform_2, window_bounds = array<i64: 32, 48>}, {pipeline_mode = #tpu.pipeline_mode<synchronous>, transform_indices = @transform_3, window_bounds = array<i64: 1, 48>}, {pipeline_mode = #tpu.pipeline_mode<synchronous>, transform_indices = @transform_4, window_bounds = array<i64: 48, 64>}, {pipeline_mode = #tpu.pipeline_mode<synchronous>, transform_indices = @transform_5, window_bounds = array<i64: 300, 64>}, {pipeline_mode = #tpu.pipeline_mode<synchronous>, transform_indices = @transform_6, window_bounds = array<i64: 1, 64>}, {pipeline_mode = #tpu.pipeline_mode<synchronous>, transform_indices = @transform_7, window_bounds = array<i64: 64, 32>}, {pipeline_mode = #tpu.pipeline_mode<synchronous>, transform_indices = @transform_8, window_bounds = array<i64: 1, 32>}, {pipeline_mode = #tpu.pipeline_mode<synchronous>, transform_indices = @transform_9, window_bounds = array<i64: 1, 32>}, {pipeline_mode = #tpu.pipeline_mode<synchronous>, transform_indices = @transform_10, window_bounds = array<i64: 1, 1>}, {transform_indices = @transform_11, window_bounds = array<i64: 128, 1>}]} {
    %c128_i32 = arith.constant 128 : i32
    %0 = arith.muli %arg0, %c128_i32 : i32
    %c0_i32 = arith.constant 0 : i32
    %c128_i32_0 = arith.constant 128 : i32
    %1 = arith.addi %c0_i32, %c128_i32_0 : i32
    %c1_i32 = arith.constant 1 : i32
    scf.for %arg16 = %c0_i32 to %1 step %c1_i32  : i32 {
      %c1_i32_35 = arith.constant 1 : i32
      %38 = arith.muli %arg16, %c1_i32_35 : i32
      %c0_i32_36 = arith.constant 0 : i32
      %39 = arith.addi %c0_i32_36, %38 : i32
      %40 = arith.addi %0, %39 : i32
      %41 = arith.index_cast %40 : i32 to index
      %42 = memref.load %arg1[%41] : memref<256xi32, #tpu.memory_space<smem>>
      %c0_i32_37 = arith.constant 0 : i32
      %c0_i32_38 = arith.constant 0 : i32
      %43 = tpu.memref_slice %arg3[%42, %c0_i32_38] : memref<3774x32xf32, #tpu.memory_space<any>> -> memref<1x32xf32, #tpu.memory_space<any>>
      %c0_i32_39 = arith.constant 0 : i32
      %44 = tpu.memref_slice %arg14[%39, %c0_i32_39] : memref<128x32xf32, #tpu.memory_space<vmem>> -> memref<1x32xf32, #tpu.memory_space<vmem>>
      %45 = tpu.memref_slice %arg15[%c0_i32_37] : memref<1x!tpu.dma_semaphore, #tpu.memory_space<semaphore_mem>> -> memref<1x!tpu.dma_semaphore, #tpu.memory_space<semaphore_mem>>
      %46 = tpu.memref_squeeze %45 : memref<1x!tpu.dma_semaphore, #tpu.memory_space<semaphore_mem>> -> memref<!tpu.dma_semaphore, #tpu.memory_space<semaphore_mem>>
      tpu.enqueue_dma source(%43 : memref<1x32xf32, #tpu.memory_space<any>>) target(%44 : memref<1x32xf32, #tpu.memory_space<vmem>>) target_semaphore(%46 : memref<!tpu.dma_semaphore, #tpu.memory_space<semaphore_mem>>)
    }
    %c128_i32_1 = arith.constant 128 : i32
    %c0_i32_2 = arith.constant 0 : i32
    %c128_i32_3 = arith.constant 128 : i32
    %2 = arith.addi %c0_i32_2, %c128_i32_3 : i32
    %c1_i32_4 = arith.constant 1 : i32
    scf.for %arg16 = %c0_i32_2 to %2 step %c1_i32_4  : i32 {
      %c0_i32_35 = arith.constant 0 : i32
      %c0_i32_36 = arith.constant 0 : i32
      %c0_i32_37 = arith.constant 0 : i32
      %38 = tpu.memref_slice %arg3[%c0_i32_36, %c0_i32_37] : memref<3774x32xf32, #tpu.memory_space<any>> -> memref<1x32xf32, #tpu.memory_space<any>>
      %c0_i32_38 = arith.constant 0 : i32
      %c0_i32_39 = arith.constant 0 : i32
      %39 = tpu.memref_slice %arg14[%c0_i32_38, %c0_i32_39] : memref<128x32xf32, #tpu.memory_space<vmem>> -> memref<1x32xf32, #tpu.memory_space<vmem>>
      %40 = tpu.memref_slice %arg15[%c0_i32_35] : memref<1x!tpu.dma_semaphore, #tpu.memory_space<semaphore_mem>> -> memref<1x!tpu.dma_semaphore, #tpu.memory_space<semaphore_mem>>
      %41 = tpu.memref_squeeze %40 : memref<1x!tpu.dma_semaphore, #tpu.memory_space<semaphore_mem>> -> memref<!tpu.dma_semaphore, #tpu.memory_space<semaphore_mem>>
      tpu.wait_dma2 semaphore(%41 : memref<!tpu.dma_semaphore, #tpu.memory_space<semaphore_mem>>) src(%38 : memref<1x32xf32, #tpu.memory_space<any>>) dst(%39 : memref<1x32xf32, #tpu.memory_space<vmem>>)
    }
    %c0 = arith.constant 0 : index
    %c0_5 = arith.constant 0 : index
    %3 = vector.load %arg14[%c0, %c0_5] : memref<128x32xf32, #tpu.memory_space<vmem>>, vector<128x32xf32>
    %c0_6 = arith.constant 0 : index
    %c0_7 = arith.constant 0 : index
    %4 = vector.load %arg4[%c0_6, %c0_7] : memref<32x48xf32, #tpu.memory_space<vmem>>, vector<32x48xf32>
    %cst = arith.constant dense<0.000000e+00> : vector<128x48xf32>
    %5 = tpu.matmul %3, %4, %cst {dimension_numbers = #tpu.dot_dimension_numbers<[1], [0], [0], [1], [0, 0, 1, 1], [], []>} : vector<128x32xf32>, vector<32x48xf32>, vector<128x48xf32> -> vector<128x48xf32>
    %c0_8 = arith.constant 0 : index
    %c0_9 = arith.constant 0 : index
    %6 = vector.load %arg5[%c0_8, %c0_9] : memref<1x48xf32, #tpu.memory_space<vmem>>, vector<1x48xf32>
    %7 = vector.broadcast %6 : vector<1x48xf32> to vector<128x48xf32>
    %8 = arith.addf %5, %7 : vector<128x48xf32>
    %cst_10 = arith.constant 0.000000e+00 : f32
    %9 = vector.broadcast %cst_10 : f32 to vector<128x48xf32>
    %10 = arith.maximumf %8, %9 : vector<128x48xf32>
    %c0_11 = arith.constant 0 : index
    %c0_12 = arith.constant 0 : index
    %11 = vector.load %arg6[%c0_11, %c0_12] : memref<48x64xf32, #tpu.memory_space<vmem>>, vector<48x64xf32>
    %cst_13 = arith.constant dense<0.000000e+00> : vector<128x64xf32>
    %12 = tpu.matmul %10, %11, %cst_13 {dimension_numbers = #tpu.dot_dimension_numbers<[1], [0], [0], [1], [0, 0, 1, 1], [], []>} : vector<128x48xf32>, vector<48x64xf32>, vector<128x64xf32> -> vector<128x64xf32>
    %c0_14 = arith.constant 0 : index
    %c0_15 = arith.constant 0 : index
    %13 = vector.load %arg2[%c0_14, %c0_15] : memref<128x300xf32, #tpu.memory_space<vmem>>, vector<128x300xf32>
    %c0_16 = arith.constant 0 : index
    %c0_17 = arith.constant 0 : index
    %14 = vector.load %arg7[%c0_16, %c0_17] : memref<300x64xf32, #tpu.memory_space<vmem>>, vector<300x64xf32>
    %cst_18 = arith.constant dense<0.000000e+00> : vector<128x64xf32>
    %15 = tpu.matmul %13, %14, %cst_18 {dimension_numbers = #tpu.dot_dimension_numbers<[1], [0], [0], [1], [0, 0, 1, 1], [], []>} : vector<128x300xf32>, vector<300x64xf32>, vector<128x64xf32> -> vector<128x64xf32>
    %16 = arith.addf %12, %15 : vector<128x64xf32>
    %c0_19 = arith.constant 0 : index
    %c0_20 = arith.constant 0 : index
    %17 = vector.load %arg8[%c0_19, %c0_20] : memref<1x64xf32, #tpu.memory_space<vmem>>, vector<1x64xf32>
    %18 = vector.broadcast %17 : vector<1x64xf32> to vector<128x64xf32>
    %19 = arith.addf %16, %18 : vector<128x64xf32>
    %cst_21 = arith.constant 0.000000e+00 : f32
    %20 = vector.broadcast %cst_21 : f32 to vector<128x64xf32>
    %21 = arith.maximumf %19, %20 : vector<128x64xf32>
    %c0_22 = arith.constant 0 : index
    %c0_23 = arith.constant 0 : index
    %22 = vector.load %arg9[%c0_22, %c0_23] : memref<64x32xf32, #tpu.memory_space<vmem>>, vector<64x32xf32>
    %cst_24 = arith.constant dense<0.000000e+00> : vector<128x32xf32>
    %23 = tpu.matmul %21, %22, %cst_24 {dimension_numbers = #tpu.dot_dimension_numbers<[1], [0], [0], [1], [0, 0, 1, 1], [], []>} : vector<128x64xf32>, vector<64x32xf32>, vector<128x32xf32> -> vector<128x32xf32>
    %c0_25 = arith.constant 0 : index
    %c0_26 = arith.constant 0 : index
    %24 = vector.load %arg10[%c0_25, %c0_26] : memref<1x32xf32, #tpu.memory_space<vmem>>, vector<1x32xf32>
    %25 = vector.broadcast %24 : vector<1x32xf32> to vector<128x32xf32>
    %26 = arith.addf %23, %25 : vector<128x32xf32>
    %cst_27 = arith.constant 0.000000e+00 : f32
    %27 = vector.broadcast %cst_27 : f32 to vector<128x32xf32>
    %28 = arith.maximumf %26, %27 : vector<128x32xf32>
    %c0_28 = arith.constant 0 : index
    %c0_29 = arith.constant 0 : index
    %29 = vector.load %arg11[%c0_28, %c0_29] : memref<1x32xf32, #tpu.memory_space<vmem>>, vector<1x32xf32>
    %30 = vector.broadcast %29 : vector<1x32xf32> to vector<128x32xf32>
    %31 = arith.mulf %28, %30 : vector<128x32xf32>
    %cst_30 = arith.constant dense<0.000000e+00> : vector<128xf32>
    %32 = vector.multi_reduction <add>, %31, %cst_30 [1] : vector<128x32xf32> to vector<128xf32>
    %33 = vector.shape_cast %32 : vector<128xf32> to vector<128x1xf32>
    %c0_31 = arith.constant 0 : index
    %c0_32 = arith.constant 0 : index
    %34 = vector.load %arg12[%c0_31, %c0_32] : memref<1x1xf32, #tpu.memory_space<vmem>>, vector<1x1xf32>
    %35 = vector.broadcast %34 : vector<1x1xf32> to vector<128x1xf32>
    %36 = arith.addf %33, %35 : vector<128x1xf32>
    %c0_33 = arith.constant 0 : index
    %c0_34 = arith.constant 0 : index
    %37 = vector.load %arg13[%c0_33, %c0_34] : memref<128x1xf32, #tpu.memory_space<vmem>>, vector<128x1xf32>
    tpu.vector_store %arg13[%c0_33, %c0_34], %36 {strides = array<i32>} : memref<128x1xf32, #tpu.memory_space<vmem>>, vector<128x1xf32>,
    return
  }
  func.func @transform_0(%arg0: i32, %arg1: memref<256xi32, #tpu.memory_space<smem>>) -> (i32, i32) {
    %c0_i32 = arith.constant 0 : i32
    %c0_i32_0 = arith.constant 0 : i32
    return %arg0, %c0_i32 : i32, i32
  }
  func.func @transform_2(%arg0: i32, %arg1: memref<256xi32, #tpu.memory_space<smem>>) -> (i32, i32) {
    %c0_i32 = arith.constant 0 : i32
    %c0_i32_0 = arith.constant 0 : i32
    %c0_i32_1 = arith.constant 0 : i32
    return %c0_i32, %c0_i32_0 : i32, i32
  }
  func.func @transform_3(%arg0: i32, %arg1: memref<256xi32, #tpu.memory_space<smem>>) -> (i32, i32) {
    %c0_i32 = arith.constant 0 : i32
    %c0_i32_0 = arith.constant 0 : i32
    %c0_i32_1 = arith.constant 0 : i32
    return %c0_i32, %c0_i32_0 : i32, i32
  }
  func.func @transform_4(%arg0: i32, %arg1: memref<256xi32, #tpu.memory_space<smem>>) -> (i32, i32) {
    %c0_i32 = arith.constant 0 : i32
    %c0_i32_0 = arith.constant 0 : i32
    %c0_i32_1 = arith.constant 0 : i32
    return %c0_i32, %c0_i32_0 : i32, i32
  }
  func.func @transform_5(%arg0: i32, %arg1: memref<256xi32, #tpu.memory_space<smem>>) -> (i32, i32) {
    %c0_i32 = arith.constant 0 : i32
    %c0_i32_0 = arith.constant 0 : i32
    %c0_i32_1 = arith.constant 0 : i32
    return %c0_i32, %c0_i32_0 : i32, i32
  }
  func.func @transform_6(%arg0: i32, %arg1: memref<256xi32, #tpu.memory_space<smem>>) -> (i32, i32) {
    %c0_i32 = arith.constant 0 : i32
    %c0_i32_0 = arith.constant 0 : i32
    %c0_i32_1 = arith.constant 0 : i32
    return %c0_i32, %c0_i32_0 : i32, i32
  }
  func.func @transform_7(%arg0: i32, %arg1: memref<256xi32, #tpu.memory_space<smem>>) -> (i32, i32) {
    %c0_i32 = arith.constant 0 : i32
    %c0_i32_0 = arith.constant 0 : i32
    %c0_i32_1 = arith.constant 0 : i32
    return %c0_i32, %c0_i32_0 : i32, i32
  }
  func.func @transform_8(%arg0: i32, %arg1: memref<256xi32, #tpu.memory_space<smem>>) -> (i32, i32) {
    %c0_i32 = arith.constant 0 : i32
    %c0_i32_0 = arith.constant 0 : i32
    %c0_i32_1 = arith.constant 0 : i32
    return %c0_i32, %c0_i32_0 : i32, i32
  }
  func.func @transform_9(%arg0: i32, %arg1: memref<256xi32, #tpu.memory_space<smem>>) -> (i32, i32) {
    %c0_i32 = arith.constant 0 : i32
    %c0_i32_0 = arith.constant 0 : i32
    %c0_i32_1 = arith.constant 0 : i32
    return %c0_i32, %c0_i32_0 : i32, i32
  }
  func.func @transform_10(%arg0: i32, %arg1: memref<256xi32, #tpu.memory_space<smem>>) -> (i32, i32) {
    %c0_i32 = arith.constant 0 : i32
    %c0_i32_0 = arith.constant 0 : i32
    %c0_i32_1 = arith.constant 0 : i32
    return %c0_i32, %c0_i32_0 : i32, i32
  }
  func.func @transform_11(%arg0: i32, %arg1: memref<256xi32, #tpu.memory_space<smem>>) -> (i32, i32) {
    %c0_i32 = arith.constant 0 : i32
    %c0_i32_0 = arith.constant 0 : i32
    return %arg0, %c0_i32 : i32, i32
  }
}

</mosaic_0001>

<bundles_post_ra>
// kernel: tpu_custom_call.1
= control target key start
LH: loop header
LB: loop body
LE: loop exit
PB: predicated region body
PF: predicated region fallthrough
CT: control target
= control target key end

     0   :  { %s2874_s0 = inlined_call_operand.vmem [shape: s32[256], index: 0, kind: input, shape index: {}]   ;;  %s2875_s1 = inlined_call_operand.vmem [shape: f32[256,300], index: 1, kind: input, shape index: {}]   ;;  %s2876_s2 = inlined_call_operand.vmem [shape: f32[3774,32], index: 2, kind: input, shape index: {}]   ;;  %s2877_s3 = inlined_call_operand.vmem [shape: f32[32,48], index: 3, kind: input, shape index: {}]   ;;  %s2878_s4 = inlined_call_operand.vmem [shape: f32[1,48], index: 4, kind: input, shape index: {}]   ;;  %s2879_s5 = inlined_call_operand.vmem [shape: f32[48,64], index: 5, kind: input, shape index: {}]   ;;  %s2880_s6 = inlined_call_operand.vmem [shape: f32[300,64], index: 6, kind: input, shape index: {}]   ;;  %s2881_s7 = inlined_call_operand.vmem [shape: f32[1,64], index: 7, kind: input, shape index: {}]   ;;  %s2882_s8 = inlined_call_operand.vmem [shape: f32[64,32], index: 8, kind: input, shape index: {}]   ;;  %s2883_s9 = inlined_call_operand.vmem [shape: f32[1,32], index: 9, kind: input, shape index: {}]   ;;  %s2884_s10 = inlined_call_operand.vmem [shape: f32[1,32], index: 10, kind: input, shape index: {}]   ;;  %s2885_s12 = inlined_call_operand.vmem [shape: f32[256,1], index: 12, kind: output, shape index: {}]   ;;  %s2886_s11 = inlined_call_operand.<no memory space> [shape: f32[1,1], index: 11, kind: input, shape index: {}]  }
   0x1   :  { %s17_s23 = sshll.u32 %s2874_s0, 4  ;;  %v21_v0 = vstv %s2886_s11  ;;  %s18_s23 = int_to_ptr.vmem [resolvable:$true] %s17_s23 }
   0x2   :  { %22 = vst [vmem:[#allocation6] sm:$0x1] %v21_v0  ;;  %s2317_s26 = scalar_lea.vmem %s18_s23, 32  ;;  %p2322_p1 = scmp.lt.s32.totalorder %s18_s23, %s18_s23 }
   0x3   :  { %p2318_p0 = scmp.ne.s32.totalorder %s18_s23, %s2317_s26  ;;  %p2323_p2 = scmp.lt.s32.totalorder %s2317_s26, %s2317_s26 }
   0x5   :  { %p2324_p3 = por %p2323_p2, %p2322_p1 }
   0x7   :  { %p2325_p4 = pnand %p2324_p3, %p2318_p0 }
   0x9   :  { %2328 = shalt.err (!%p2325_p4)  }
   0xa   :  { %s2357_s27 = smov [#allocation5]  }
   0xb   :  { %20 = dma.vmem_to_smem %s18_s23, 32, %s2357_s27, [#allocation4] }
   0xc   :  { %2341 = dma.done.wait [#allocation4], 32 }
   0xd   :  { %2342 = vsyncadd [#allocation4], 4294967264 }
   0xe   :  { %24 = sfence }
   0xf   :  { %s2430_s28 = smov 0  }
  0x10 LB: > { %s1765_s0 = sadd.s32 4294967295, %s2347_s28   ;;  %p1769_p5 = scmp.ge.s32.totalorder %s2347_s28, 1  ;;  %s2347_s28 = sphi %s2430_s28, %s30_s28  }
  0x11   : > { %p324_p6 = scmp.lt.s32.totalorder %s2347_s28, 3 }
  0x13   : > { %p325_p7 = pnand %p1769_p5, %p324_p6 }
  0x14   : > { %s1770_s11 = sshll.u32 (!%p325_p7), %s1765_s0, 4  ;;  %s1774_s29 = sshll.u32 (!%p325_p7), %s1765_s0, 7 }
  0x15   : > { %328 = sbr.rel (%p325_p7) target bundleno = 900 (0x384), region = 60  ;;  %p364_p8 = scmp.lt.s32.totalorder (!%p325_p7), %s1770_s11, 31 }
  0x16   : > { %s2349_s20 = smov (!%p325_p7), 0  }
  0x1c   : > { %s2890_s11 = smov (!%p364_p8, %s1770_s11), 31 }
  0x1d   : > { %s2290_s30 = smul.u32 24, %s2890_s11  ;;  %s1773_s13 = sshll.u32 %s2890_s11, 3 }
  0x1e   : > { %s2441_s16 = scalar_lea.vmem %s2885_s12, %s1773_s13 }
  0x1f   : > { %s2446_s19 = scalar_lea.vmem %s2875_s1, %s2290_s30 }
  0x20 LB: >> { %s383_s21 = sadd.s32 %s2351_s20, %s1774_s29  ;;  %s386_s26 = scalar_lea.vmem [#allocation2], %s2351_s20  ;;  %s2351_s20 = sphi %s2349_s20, %s382_s20  }
  0x21   : >> { %s384_s22 = sld [smem:[#allocation5 + %s383_s21]] }
  0x27   : >> { %s385_s25 = scalar_lea.vmem %s2876_s2, %s384_s22 }
  0x28   : >> { %v404_v1 = vld [vmem:[%s385_s25] sm:$0x1] }
  0x29   : >> { %405 = vst [vmem:[%s386_s26] sm:$0x1] %v404_v1 }
  0x2a   : >> { %430 = vsyncadd [#allocation3], 16  ;;  %s382_s20 = sadd.s32 1, %s2351_s20  }
  0x2b   : >> { %p379_p9 = scmp.ge.s32.totalorder %s382_s20, 128  }
  0x2c   : > { %s2353_s27 = smov (%p379_p9), 0  }
  0x2d   : > { %381 = sbr.rel (!%p379_p9) target bundleno = 32 (0x20), region = 146 }
  0x34 LB: >> { %2343 = dma.done.wait [#allocation3], 16  ;;  %s2355_s27 = sphi %s2353_s27, %s436_s27  }
  0x35   : >> { %2344 = vsyncadd [#allocation3], 4294967280  ;;  %s436_s27 = sadd.s32 1, %s2355_s27  }
  0x36   : >> { %p433_p10 = scmp.ge.s32.totalorder %s436_s27, 128  }
  0x37   : > { %v456_v2 = vld [vmem:[%s2877_s3] sm:$0xff] (%p433_p10)  ;;  %v457_v3 = vld [vmem:[%s2877_s3 + $0x8] sm:$0xff] (%p433_p10)  ;;  %v458_v4 = vld [vmem:[%s2877_s3 + $0x10] sm:$0xff] (%p433_p10)  ;;  %vm467_vm0 = vcmask (%p433_p10), 261120   ;;  %vm818_vm1 = vcmask (%p433_p10), 1043456   ;;  %vm2358_vm2 = vmmov (%p433_p10), 1  }
  0x38   : > { %435 = sbr.rel (!%p433_p10) target bundleno = 52 (0x34), region = 157  ;;  %v2160_v5 = vpack.c.bf16 (%p433_p10), %v457_v3, %v456_v2  ;;  %v459_v6 = vld [vmem:[%s2877_s3 + $0x18] sm:$0xff] (%p433_p10)  ;;  %v440_v7 = vld [vmem:[#allocation2] sm:$0xff] (%p433_p10)  ;;  %v748_v10 = vld [vmem:[%s2880_s6 + $0x88] sm:$0xff] (%p433_p10)  ;;  %vm769_vm4 = vcmask (%p433_p10), 359424   ;;  %vm1112_vm5 = vcmask (%p433_p10), 392192  }
  0x39   : > { %v2164_v8 = vpack.c.bf16 (%p433_p10), %v459_v6, %v458_v4  ;;  %2024 = vmatprep.mubr.msk.f32.mxu0 (%p433_p10), %vm467_vm0, %v440_v7  ;;  %v747_v9 = vld [vmem:[%s2880_s6 + $0x80] sm:$0xff] (%p433_p10)  ;;  %v732_v12 = vld [vmem:[%s2880_s6 + $0x8] sm:$0xff] (%p433_p10)  ;;  %v749_v16 = vld [vmem:[%s2880_s6 + $0x90] sm:$0xff] (%p433_p10)  ;;  %vm1360_vm6 = vcmask (%p433_p10), 523264   ;;  %vm1664_vm7 = vcmask (%p433_p10), 7168  }
  0x3a   : > { %2161 = vmatprep.subr.bf16.mxu0 (%p433_p10), %v2160_v5  ;;  %v731_v11 = vld [vmem:[%s2880_s6] sm:$0xff] (%p433_p10)  ;;  %v441_v13 = vld [vmem:[#allocation2 + $0x8] sm:$0xff] (%p433_p10)  ;;  %v2168_v14 = vpack.c.bf16 (%p433_p10), %v748_v10, %v747_v9  ;;  %v750_v17 = vld [vmem:[%s2880_s6 + $0x98] sm:$0xff] (%p433_p10) }
  0x3b   : > { %2163 = vmatpush3.bf16.msra.mxu0 (%p433_p10), %v2160_v5  ;;  %v2170_v15 = vpack.c.bf16 (%p433_p10), %v732_v12, %v731_v11  ;;  %v442_v18 = vld [vmem:[#allocation2 + $0x10] sm:$0xff] (%p433_p10)  ;;  %v2172_v19 = vpack.c.bf16 (%p433_p10), %v750_v17, %v749_v16  ;;  %v734_v21 = vld [vmem:[%s2880_s6 + $0x18] sm:$0xff] (%p433_p10)  ;;  %v751_v22 = vld [vmem:[%s2880_s6 + $0xa0] sm:$0xff] (%p433_p10) }
  0x3c   : > { %2165 = vmatprep.subr.bf16.mxu0 (%p433_p10), %v2164_v8  ;;  %v733_v20 = vld [vmem:[%s2880_s6 + $0x10] sm:$0xff] (%p433_p10)  ;;  %v752_v23 = vld [vmem:[%s2880_s6 + $0xa8] sm:$0xff] (%p433_p10)  ;;  %2242 = vmatprep.subr.bf16.mxu1 (%p433_p10), %v2168_v14  ;;  %v443_v24 = vld [vmem:[#allocation2 + $0x18] sm:$0xff] (%p433_p10) }
  0x3d   : > { %2250 = vmatpush3.bf16.msra.mxu1 (%p433_p10), %v2170_v15  ;;  %v2174_v25 = vpack.c.bf16 (%p433_p10), %v734_v21, %v733_v20  ;;  %v444_v26 = vld [vmem:[#allocation2 + $0x20] sm:$0xff] (%p433_p10)  ;;  %v2176_v27 = vpack.c.bf16 (%p433_p10), %v752_v23, %v751_v22  ;;  %v736_v29 = vld [vmem:[%s2880_s6 + $0x28] sm:$0xff] (%p433_p10)  ;;  %v753_v30 = vld [vmem:[%s2880_s6 + $0xb0] sm:$0xff] (%p433_p10) }
  0x3e   : > { %v735_v28 = vld [vmem:[%s2880_s6 + $0x20] sm:$0xff] (%p433_p10)  ;;  %2243 = vmatprep.subr.bf16.mxu1 (%p433_p10), %v2172_v19  ;;  %v754_v31 = vld [vmem:[%s2880_s6 + $0xb8] sm:$0xff] (%p433_p10)  ;;  %v445_v32 = vld [vmem:[#allocation2 + $0x28] sm:$0xff] (%p433_p10) }
  0x3f   : > { %2167 = vmatpush3.bf16.msra.mxu0 %v2164_v8  ;;  %v2178_v33 = vpack.c.bf16 %v736_v29, %v735_v28  ;;  %v446_v34 = vld [vmem:[#allocation2 + $0x30] sm:$0xff]  ;;  %v2180_v35 = vpack.c.bf16 %v754_v31, %v753_v30  ;;  %v738_v37 = vld [vmem:[%s2880_s6 + $0x38] sm:$0xff]  ;;  %v755_v38 = vld [vmem:[%s2880_s6 + $0xc0] sm:$0xff] }
  0x40   : > { %2169 = vmatprep.subr.bf16.mxu0 %v2168_v14  ;;  %v737_v36 = vld [vmem:[%s2880_s6 + $0x30] sm:$0xff]  ;;  %v756_v39 = vld [vmem:[%s2880_s6 + $0xc8] sm:$0xff]  ;;  %v447_v40 = vld [vmem:[#allocation2 + $0x38] sm:$0xff] }
  0x41   : > { %2251 = vmatpush3.bf16.msra.mxu1 %v2174_v25  ;;  %v2182_v41 = vpack.c.bf16 %v738_v37, %v737_v36  ;;  %v448_v42 = vld [vmem:[#allocation2 + $0x40] sm:$0xff]  ;;  %v2184_v43 = vpack.c.bf16 %v756_v39, %v755_v38  ;;  %v740_v45 = vld [vmem:[%s2880_s6 + $0x48] sm:$0xff]  ;;  %v757_v46 = vld [vmem:[%s2880_s6 + $0xd0] sm:$0xff] }
  0x42   : > { %2025 = vmatmul.mubr.msk.f32.vlgmr.msra.gmra.mrb[0].mxu0 %vm467_vm0, %v441_v13  ;;  %2244 = vmatprep.subr.bf16.mxu1 %v2176_v27  ;;  %v739_v44 = vld [vmem:[%s2880_s6 + $0x40] sm:$0xff]  ;;  %v758_v47 = vld [vmem:[%s2880_s6 + $0xd8] sm:$0xff]  ;;  %v449_v48 = vld [vmem:[#allocation2 + $0x48] sm:$0xff] }
  0x43   : > { %2027 = vmatprep.mubr.msk.f32.mxu0 %vm467_vm0, %v442_v18  ;;  %2171 = vmatpush3.bf16.msra.mxu0 %v2170_v15  ;;  %v2186_v49 = vpack.c.bf16 %v740_v45, %v739_v44  ;;  %v693_v50 = vld [vmem:[%s2446_s19 + $0x50] sm:$0xff]  ;;  %v2188_v52 = vpack.c.bf16 %v758_v47, %v757_v46  ;;  %v742_v54 = vld [vmem:[%s2880_s6 + $0x58] sm:$0xff]  ;;  %v759_v55 = vld [vmem:[%s2880_s6 + $0xe0] sm:$0xff] }
  0x44   : > { %2173 = vmatprep.subr.bf16.mxu0 %v2172_v19  ;;  %v450_v51 = vld [vmem:[#allocation2 + $0x50] sm:$0xff]  ;;  %v760_v56 = vld [vmem:[%s2880_s6 + $0xe8] sm:$0xff]  ;;  %901 = vmatprep.mubr.f32.mxu1 %v693_v50  ;;  %v451_v57 = vld [vmem:[#allocation2 + $0x58] sm:$0xff] }
  0x45   : > { %2252 = vmatpush3.bf16.msra.mxu1 %v2178_v33  ;;  %v741_v53 = vld [vmem:[%s2880_s6 + $0x50] sm:$0xff]  ;;  %v452_v59 = vld [vmem:[#allocation2 + $0x60] sm:$0xff]  ;;  %v2192_v60 = vpack.c.bf16 %v760_v56, %v759_v55  ;;  %v744_v62 = vld [vmem:[%s2880_s6 + $0x68] sm:$0xff] }
  0x46   : > { %2028 = vmatmul.mubr.msk.f32.gmra.mrb[2].mxu0 %vm467_vm0, %v443_v24  ;;  %2245 = vmatprep.subr.bf16.mxu1 %v2180_v35  ;;  %v2190_v58 = vpack.c.bf16 %v742_v54, %v741_v53  ;;  %v743_v61 = vld [vmem:[%s2880_s6 + $0x60] sm:$0xff]  ;;  %v761_v63 = vld [vmem:[%s2880_s6 + $0xf0] sm:$0xff]  ;;  %v762_v0 = vld [vmem:[%s2880_s6 + $0xf8] sm:$0xff] }
  0x47   : > { %2030 = vmatprep.mubr.msk.f32.mxu0 %vm467_vm0, %v444_v26  ;;  %2175 = vmatpush3.bf16.msra.mxu0 %v2174_v25  ;;  %v453_v1 = vld [vmem:[#allocation2 + $0x68] sm:$0xff]  ;;  %v2194_v2 = vpack.c.bf16 %v744_v62, %v743_v61  ;;  %v454_v3 = vld [vmem:[#allocation2 + $0x70] sm:$0xff]  ;;  %v2196_v4 = vpack.c.bf16 %v762_v0, %v761_v63  ;;  %v746_v6 = vld [vmem:[%s2880_s6 + $0x78] sm:$0xff] }
  0x48   : > { %2177 = vmatprep.subr.bf16.mxu0 %v2176_v27  ;;  %v745_v5 = vld [vmem:[%s2880_s6 + $0x70] sm:$0xff]  ;;  %v763_v7 = vld [vmem:[%s2880_s6 + $0x100] sm:$0xff]  ;;  %v764_v8 = vld [vmem:[%s2880_s6 + $0x108] sm:$0xff] }
  0x49   : > { %2253 = vmatpush3.bf16.msra.mxu1 %v2182_v41  ;;  %v455_v9 = vld [vmem:[#allocation2 + $0x78] sm:$0xff]  ;;  %v2198_v10 = vpack.c.bf16 %v746_v6, %v745_v5  ;;  %v684_v11 = vld [vmem:[%s2446_s19 + $0x8] sm:$0xff]  ;;  %v2200_v12 = vpack.c.bf16 %v764_v8, %v763_v7  ;;  %v765_v13 = vld [vmem:[%s2880_s6 + $0x110] sm:$0xff] }
  0x4a   : > { %2031 = vmatmul.mubr.msk.f32.gmra.mrb[4].mxu0 %vm467_vm0, %v445_v32  ;;  %2246 = vmatprep.subr.bf16.mxu1 %v2184_v43  ;;  %v766_v14 = vld [vmem:[%s2880_s6 + $0x118] sm:$0xff]  ;;  %v692_v15 = vld [vmem:[%s2446_s19 + $0x48] sm:$0xff]  ;;  %v683_v16 = vld [vmem:[%s2446_s19] sm:$0xff] }
  0x4b   : > { %2033 = vmatprep.mubr.msk.f32.mxu0 %vm467_vm0, %v446_v34  ;;  %2179 = vmatpush3.bf16.msra.mxu0 %v2178_v33  ;;  %v696_v17 = vld [vmem:[%s2446_s19 + $0x68] sm:$0xff]  ;;  %v687_v18 = vld [vmem:[%s2446_s19 + $0x20] sm:$0xff]  ;;  %v2204_v19 = vpack.c.bf16 %v766_v14, %v765_v13  ;;  %v686_v23 = vld [vmem:[%s2446_s19 + $0x18] sm:$0xff] }
  0x4c   : > { %2181 = vmatprep.subr.bf16.mxu0 %v2180_v35  ;;  %v767_v20 = vld [vmem:[%s2880_s6 + $0x120] sm:$0xff]  ;;  %v768_v21 = vld [vmem:[%s2880_s6 + $0x128] sm:$0xf]  ;;  %v690_v25 = vld [vmem:[%s2446_s19 + $0x38] sm:$0xff] }
  0x4d   : > { %2254 = vmatpush3.bf16.msra.mxu1 %v2186_v49  ;;  %v695_v22 = vld [vmem:[%s2446_s19 + $0x60] sm:$0xff]  ;;  %v2208_v26 = vpack.c.bf16 %v768_v21, %v767_v20  ;;  %vm2603_vm3 = vmpackc.low %vm818_vm1, %vm2358_vm2  ;;  %v678_v29 = vld [vmem:[%s2879_s5 + $0x8] sm:$0xff] }
  0x4e   : > { %2034 = vmatmul.mubr.msk.f32.gmra.mrb[6].mxu0 %vm467_vm0, %v447_v40  ;;  %2247 = vmatprep.subr.bf16.mxu1 %v2188_v52  ;;  %v699_v24 = vld [vmem:[%s2446_s19 + $0x80] sm:$0xff]  ;;  %v698_v30 = vld [vmem:[%s2446_s19 + $0x78] sm:$0xff]  ;;  %v689_v31 = vld [vmem:[%s2446_s19 + $0x30] sm:$0xff] }
  0x4f   : > { %2036 = vmatprep.mubr.msk.f32.mxu0 %vm467_vm0, %v448_v42  ;;  %2183 = vmatpush3.bf16.msra.mxu0 %v2182_v41  ;;  %v677_v28 = vld [vmem:[%s2879_s5] sm:$0xff]  ;;  %v702_v32 = vld [vmem:[%s2446_s19 + $0x98] sm:$0xff]  ;;  %v685_v33 = vld [vmem:[%s2446_s19 + $0x10] sm:$0xff] }
  0x50   : > { %2185 = vmatprep.subr.bf16.mxu0 %v2184_v43  ;;  %v2214_v34 = vpack.c.bf16 %v678_v29, %v677_v28  ;;  %v679_v35 = vld [vmem:[%s2879_s5 + $0x10] sm:$0xff]  ;;  %v680_v36 = vld [vmem:[%s2879_s5 + $0x18] sm:$0xff]  ;;  %v688_v38 = vld [vmem:[%s2446_s19 + $0x28] sm:$0xff] }
  0x51   : > { %2255 = vmatpush3.bf16.msra.mxu1 %v2190_v58  ;;  %v701_v37 = vld [vmem:[%s2446_s19 + $0x90] sm:$0xff]  ;;  %v691_v40 = vld [vmem:[%s2446_s19 + $0x40] sm:$0xff]  ;;  %v2218_v41 = vpack.c.bf16 %v680_v36, %v679_v35  ;;  %v682_v43 = vld [vmem:[%s2879_s5 + $0x28] sm:$0xff] }
  0x52   : > { %2037 = vmatmul.mubr.msk.f32.gmra.mrb[8].mxu0 %vm467_vm0, %v449_v48  ;;  %2248 = vmatprep.subr.bf16.mxu1 %v2192_v60  ;;  %v705_v39 = vld [vmem:[%s2446_s19 + $0xb0] sm:$0xff]  ;;  %v681_v42 = vld [vmem:[%s2879_s5 + $0x20] sm:$0xff]  ;;  %v694_v44 = vld [vmem:[%s2446_s19 + $0x58] sm:$0xff] }
  0x53   : > { %2039 = vmatprep.mubr.msk.f32.mxu0 %vm467_vm0, %v450_v51  ;;  %2187 = vmatpush3.bf16.msra.mxu0 %v2186_v49  ;;  %v697_v45 = vld [vmem:[%s2446_s19 + $0x70] sm:$0xff]  ;;  %v2222_v46 = vpack.c.bf16 %v682_v43, %v681_v42  ;;  %v700_v47 = vld [vmem:[%s2446_s19 + $0x88] sm:$0xff]  ;;  %v703_v48 = vld [vmem:[%s2446_s19 + $0xa0] sm:$0xff] }
  0x54   : > { %2189 = vmatprep.subr.bf16.mxu0 %v2188_v52  ;;  %v706_v49 = vld [vmem:[%s2446_s19 + $0xb8] sm:$0xff]  ;;  %v709_v50 = vld [vmem:[%s2446_s19 + $0xd0] sm:$0xff]  ;;  %v712_v51 = vld [vmem:[%s2446_s19 + $0xe8] sm:$0xff] }
  0x55   : > { %2256 = vmatpush3.bf16.msra.mxu1 %v2194_v2  ;;  %v715_v52 = vld [vmem:[%s2446_s19 + $0x100] sm:$0xff]  ;;  %v718_v53 = vld [vmem:[%s2446_s19 + $0x118] sm:$0xff]  ;;  %v721_v54 = vld [vmem:[%s2446_s19 + $0x130] sm:$0xff] }
  0x56   : > { %2040 = vmatmul.mubr.msk.f32.gmra.mrb[10].mxu0 %vm467_vm0, %v451_v57  ;;  %2249 = vmatprep.subr.bf16.mxu1 %v2196_v4  ;;  %v724_v55 = vld [vmem:[%s2446_s19 + $0x148] sm:$0xff]  ;;  %v727_v57 = vld [vmem:[%s2446_s19 + $0x160] sm:$0xff]  ;;  %v710_v62 = vld [vmem:[%s2446_s19 + $0xd8] sm:$0xff] }
  0x57   : > { %2042 = vmatprep.mubr.msk.f32.mxu0 %vm467_vm0, %v452_v59  ;;  %2191 = vmatpush3.bf16.msra.mxu0 %v2190_v58  ;;  %v704_v56 = vld [vmem:[%s2446_s19 + $0xa8] sm:$0xff]  ;;  %v730_v59 = vld [vmem:[%s2446_s19 + $0x178] sm:$0xff]  ;;  %v711_v61 = vld [vmem:[%s2446_s19 + $0xe0] sm:$0xff] }
  0x58   : > { %2193 = vmatprep.subr.bf16.mxu0 %v2192_v60  ;;  %v708_v58 = vld [vmem:[%s2446_s19 + $0xc8] sm:$0xff]  ;;  %v707_v60 = vld [vmem:[%s2446_s19 + $0xc0] sm:$0xff]  ;;  %v714_v63 = vld [vmem:[%s2446_s19 + $0xf8] sm:$0xff] }
  0x59   : > { %2257 = vmatpush3.bf16.msra.mxu1 %v2198_v10  ;;  %v713_v0 = vld [vmem:[%s2446_s19 + $0xf0] sm:$0xff]  ;;  %v723_v5 = vld [vmem:[%s2446_s19 + $0x140] sm:$0xff]  ;;  %v722_v6 = vld [vmem:[%s2446_s19 + $0x138] sm:$0xff] }
  0x5a   : > { %2043 = vmatmul.mubr.msk.f32.gmra.mrb[12].mxu0 %vm467_vm0, %v453_v1  ;;  %v717_v1 = vld [vmem:[%s2446_s19 + $0x110] sm:$0xff]  ;;  %v726_v7 = vld [vmem:[%s2446_s19 + $0x158] sm:$0xff] }
  0x5b   : > { %2045 = vmatprep.mubr.msk.f32.mxu0 %vm467_vm0, %v454_v3  ;;  %2195 = vmatpush3.bf16.msra.mxu0 %v2194_v2  ;;  %v716_v2 = vld [vmem:[%s2446_s19 + $0x108] sm:$0xff]  ;;  %v725_v8 = vld [vmem:[%s2446_s19 + $0x150] sm:$0xff]  ;;  %v1352_v21 = vld [vmem:[%s2882_s8 + $0x38] sm:$0xff] }
  0x5c   : > { %2197 = vmatprep.subr.bf16.mxu0 %v2196_v4  ;;  %902 = vmatmul.mubr.f32.vlgmr.msra.gmra.mrb[0].mxu1 %v692_v15  ;;  %v720_v3 = vld [vmem:[%s2446_s19 + $0x128] sm:$0xff]  ;;  %v719_v4 = vld [vmem:[%s2446_s19 + $0x120] sm:$0xff]  ;;  %v1347_v14 = vld [vmem:[%s2882_s8 + $0x10] sm:$0xff] }
  0x5d   : > { %906 = vmatprep.mubr.f32.mxu1 %v696_v17  ;;  %v1348_v15 = vld [vmem:[%s2882_s8 + $0x18] sm:$0xff]  ;;  %v1351_v20 = vld [vmem:[%s2882_s8 + $0x30] sm:$0xff] }
  0x5e   : > { %2046 = vmatmul.mubr.msk.f32.gmra.mrb[14].mxu0 %vm467_vm0, %v455_v9  ;;  %v729_v9 = vld [vmem:[%s2446_s19 + $0x170] sm:$0xff]  ;;  %v2230_v17 = vpack.c.bf16 %v1348_v15, %v1347_v14 }
  0x5f   : > { %2199 = vmatpush3.bf16.msra.mxu0 %v2198_v10  ;;  %886 = vmatprep.mubr.f32.mxu0 %v684_v11  ;;  %v728_v10 = vld [vmem:[%s2446_s19 + $0x168] sm:$0xff]  ;;  %v1345_v11 = vld [vmem:[%s2882_s8] sm:$0xff] }
  0x60   : > { %2201 = vmatprep.subr.bf16.mxu0 %v2200_v12  ;;  %907 = vmatmul.mubr.f32.gmra.mrb[2].mxu1 %v695_v22  ;;  %v2238_v22 = vpack.c.bf16 %v1352_v21, %v1351_v20 }
  0x61   : > { %911 = vmatprep.mubr.f32.mxu1 %v699_v24 }
  0x62   : > { %887 = vmatmul.mubr.f32.vlgmr.msra.gmra.mrb[16].mxu0 %v683_v16  ;;  %v1349_v16 = vld [vmem:[%s2882_s8 + $0x20] sm:$0xff] }
  0x63   : > { %2203 = vmatpush3.bf16.msra.mxu0 %v2200_v12  ;;  %891 = vmatprep.mubr.f32.mxu0 %v687_v18  ;;  %v1346_v12 = vld [vmem:[%s2882_s8 + $0x8] sm:$0xff] }
  0x64   : > { %2205 = vmatprep.subr.bf16.mxu0 %v2204_v19  ;;  %912 = vmatmul.mubr.f32.gmra.mrb[4].mxu1 %v698_v30  ;;  %v2226_v13 = vpack.c.bf16 %v1346_v12, %v1345_v11  ;;  %v1350_v18 = vld [vmem:[%s2882_s8 + $0x28] sm:$0xff] }
  0x65   : > { %916 = vmatprep.mubr.f32.mxu1 %v702_v32 }
  0x66   : > { %892 = vmatmul.mubr.f32.gmra.mrb[18].mxu0 %v686_v23  ;;  %2227 = vmatprep.subr.bf16.mxu1 %v2226_v13  ;;  %v1775_v23 = vld [vmem:[%s2878_s4] ss:$0 sm:$0xff] }
  0x67   : > { %2207 = vmatpush3.bf16.msra.mxu0 %v2204_v19  ;;  %896 = vmatprep.mubr.f32.mxu0 %v690_v25  ;;  %v2234_v19 = vpack.c.bf16 %v1350_v18, %v1349_v16 }
  0x68   : > { %2210 = vmatprep.subr.msk.bf16.mxu0 %vm2603_vm3, %v2208_v26  ;;  %917 = vmatmul.mubr.f32.gmra.mrb[6].mxu1 %v701_v37 }
  0x69   : > { %921 = vmatprep.mubr.f32.mxu1 %v705_v39  ;;  %2229 = vmatpush3.bf16.msra.mxu1 %v2226_v13 }
  0x6a   : > { %897 = vmatmul.mubr.f32.gmra.mrb[20].mxu0 %v689_v31  ;;  %2231 = vmatprep.subr.bf16.mxu1 %v2230_v17 }
  0x6b   : > { %2213 = vmatpush3.bf16.msk.msra.mxu0 %vm2603_vm3, %v2208_v26  ;;  %2060 = vmatprep.mubr.msk.f32.mxu0 %vm769_vm4, %v685_v33 }
  0x6c   : > { %2215 = vmatprep.subr.bf16.mxu0 %v2214_v34  ;;  %922 = vmatmul.mubr.f32.gmra.mrb[8].mxu1 %v704_v56 }
  0x6d   : > { %926 = vmatprep.mubr.f32.mxu1 %v708_v58  ;;  %2233 = vmatpush3.bf16.msra.mxu1 %v2230_v17 }
  0x6e   : > { %2061 = vmatmul.mubr.msk.f32.vlgmr.msra.gmra.mrb[22].mxu0 %vm769_vm4, %v688_v38  ;;  %2235 = vmatprep.subr.bf16.mxu1 %v2234_v19 }
  0x6f   : > { %2217 = vmatpush3.bf16.msra.mxu0 %v2214_v34  ;;  %2063 = vmatprep.mubr.msk.f32.mxu0 %vm769_vm4, %v691_v40 }
  0x70   : > { %2219 = vmatprep.subr.bf16.mxu0 %v2218_v41  ;;  %927 = vmatmul.mubr.f32.gmra.mrb[10].mxu1 %v707_v60 }
  0x71   : > { %931 = vmatprep.mubr.f32.mxu1 %v711_v61  ;;  %2237 = vmatpush3.bf16.msra.mxu1 %v2234_v19 }
  0x72   : > { %2064 = vmatmul.mubr.msk.f32.gmra.mrb[24].mxu0 %vm769_vm4, %v694_v44  ;;  %2239 = vmatprep.subr.bf16.mxu1 %v2238_v22 }
  0x73   : > { %2066 = vmatprep.mubr.msk.f32.mxu0 %vm769_vm4, %v697_v45  ;;  %2221 = vmatpush3.bf16.msra.mxu0 %v2218_v41 }
  0x74   : > { %2223 = vmatprep.subr.bf16.mxu0 %v2222_v46  ;;  %932 = vmatmul.mubr.f32.gmra.mrb[12].mxu1 %v710_v62 }
  0x75   : > { %936 = vmatprep.mubr.f32.mxu1 %v714_v63  ;;  %2241 = vmatpush3.bf16.msra.mxu1 %v2238_v22 }
  0x76   : > { %2067 = vmatmul.mubr.msk.f32.gmra.mrb[26].mxu0 %vm769_vm4, %v700_v47 }
  0x77   : > { %2069 = vmatprep.mubr.msk.f32.mxu0 %vm769_vm4, %v703_v48  ;;  %2225 = vmatpush3.bf16.msra.mxu0 %v2222_v46 }
  0x78   : > { %937 = vmatmul.mubr.f32.gmra.mrb[14].mxu1 %v713_v0 }
  0x79   : > { %941 = vmatprep.mubr.f32.mxu1 %v717_v1 }
  0x7a   : > { %2070 = vmatmul.mubr.msk.f32.gmra.mrb[28].mxu0 %vm769_vm4, %v706_v49 }
  0x7b   : > { %2072 = vmatprep.mubr.msk.f32.mxu0 %vm769_vm4, %v709_v50 }
  0x7c   : > { %942 = vmatmul.mubr.f32.gmra.mrb[16].mxu1 %v716_v2 }
  0x7d   : > { %946 = vmatprep.mubr.f32.mxu1 %v720_v3 }
  0x7e   : > { %2073 = vmatmul.mubr.msk.f32.gmra.mrb[30].mxu0 %vm769_vm4, %v712_v51 }
  0x7f   : > { %2075 = vmatprep.mubr.msk.f32.mxu0 %vm769_vm4, %v715_v52 }
  0x80   : > { %947 = vmatmul.mubr.f32.gmra.mrb[18].mxu1 %v719_v4 }
  0x81   : > { %951 = vmatprep.mubr.f32.mxu1 %v723_v5 }
  0x82   : > { %2076 = vmatmul.mubr.msk.f32.gmra.mrb[32].mxu0 %vm769_vm4, %v718_v53 }
  0x83   : > { %2078 = vmatprep.mubr.msk.f32.mxu0 %vm769_vm4, %v721_v54 }
  0x84   : > { %952 = vmatmul.mubr.f32.gmra.mrb[20].mxu1 %v722_v6 }
  0x85   : > { %956 = vmatprep.mubr.f32.mxu1 %v726_v7 }
  0x86   : > { %2079 = vmatmul.mubr.msk.f32.gmra.mrb[34].mxu0 %vm769_vm4, %v724_v55 }
  0x87   : > { %2081 = vmatprep.mubr.msk.f32.mxu0 %vm769_vm4, %v727_v57 }
  0x88   : > { %957 = vmatmul.mubr.f32.gmra.mrb[22].mxu1 %v725_v8 }
  0x89   : > { %961 = vmatprep.mubr.f32.mxu1 %v729_v9 }
  0x8a   : > { %2082 = vmatmul.mubr.msk.f32.gmra.mrb[36].mxu0 %vm769_vm4, %v730_v59 }
  0x8c   : > { %962 = vmatmul.mubr.f32.gmra.mrb[24].mxu1 %v728_v10 }
 0x115   : > { %v2026_v24 = vpop.f32.mrb[0].mxu0 }
 0x116   : > { %v588_v25 = vadd.f32 %v2026_v24, %v1775_v23  ;;  %v582_v26 = vpop.f32.mrb[1].mxu0 }
 0x117   : > { %v583_v27 = vadd.f32 %v1775_v23, %v582_v26 }
 0x118   : > { %v662_v30 = vmax.f32 %v588_v25, 0.0 }
 0x119   : > { %v661_v28 = vmax.f32 %v583_v27, 0.0  ;;  %v2029_v29 = vpop.f32.mrb[2].mxu0 }
 0x11a   : > { %v598_v31 = vadd.f32 %v2029_v29, %v1775_v23  ;;  %v592_v32 = vpop.f32.mrb[3].mxu0 }
 0x11b   : > { %v593_v33 = vadd.f32 %v1775_v23, %v592_v32  ;;  %2096 = vmatprep.mubr.msk.f32.mxu0 %vm1112_vm5, %v661_v28 }
 0x11c   : > { %2097 = vmatmul.mubr.msk.f32.vlgmr.msra.gmra.mrb[22].mxu0 %vm1112_vm5, %v662_v30  ;;  %v664_v36 = vmax.f32 %v598_v31, 0.0 }
 0x11d   : > { %v663_v34 = vmax.f32 %v593_v33, 0.0  ;;  %v2032_v35 = vpop.f32.mrb[4].mxu0 }
 0x11e   : > { %v608_v37 = vadd.f32 %v2032_v35, %v1775_v23  ;;  %v602_v38 = vpop.f32.mrb[5].mxu0 }
 0x11f   : > { %v603_v39 = vadd.f32 %v1775_v23, %v602_v38  ;;  %2099 = vmatprep.mubr.msk.f32.mxu0 %vm1112_vm5, %v663_v34 }
 0x120   : > { %v666_v40 = vmax.f32 %v608_v37, 0.0  ;;  %2100 = vmatmul.mubr.msk.f32.gmra.mrb[24].mxu0 %vm1112_vm5, %v664_v36 }
 0x121   : > { %v665_v41 = vmax.f32 %v603_v39, 0.0  ;;  %v2035_v42 = vpop.f32.mrb[6].mxu0 }
 0x122   : > { %v618_v43 = vadd.f32 %v2035_v42, %v1775_v23  ;;  %v612_v44 = vpop.f32.mrb[7].mxu0 }
 0x123   : > { %v613_v45 = vadd.f32 %v1775_v23, %v612_v44  ;;  %2102 = vmatprep.mubr.msk.f32.mxu0 %vm1112_vm5, %v665_v41 }
 0x124   : > { %v668_v46 = vmax.f32 %v618_v43, 0.0  ;;  %2103 = vmatmul.mubr.msk.f32.gmra.mrb[26].mxu0 %vm1112_vm5, %v666_v40 }
 0x125   : > { %v667_v47 = vmax.f32 %v613_v45, 0.0  ;;  %v2038_v48 = vpop.f32.mrb[8].mxu0 }
 0x126   : > { %v628_v49 = vadd.f32 %v2038_v48, %v1775_v23  ;;  %v622_v50 = vpop.f32.mrb[9].mxu0 }
 0x127   : > { %v623_v51 = vadd.f32 %v1775_v23, %v622_v50  ;;  %2105 = vmatprep.mubr.msk.f32.mxu0 %vm1112_vm5, %v667_v47 }
 0x128   : > { %v670_v52 = vmax.f32 %v628_v49, 0.0  ;;  %2106 = vmatmul.mubr.msk.f32.gmra.mrb[28].mxu0 %vm1112_vm5, %v668_v46 }
 0x129   : > { %v669_v53 = vmax.f32 %v623_v51, 0.0  ;;  %v2041_v54 = vpop.f32.mrb[10].mxu0 }
 0x12a   : > { %v638_v55 = vadd.f32 %v2041_v54, %v1775_v23  ;;  %v632_v56 = vpop.f32.mrb[11].mxu0 }
 0x12b   : > { %v633_v57 = vadd.f32 %v1775_v23, %v632_v56  ;;  %2108 = vmatprep.mubr.msk.f32.mxu0 %vm1112_vm5, %v669_v53 }
 0x12c   : > { %v672_v58 = vmax.f32 %v638_v55, 0.0  ;;  %2109 = vmatmul.mubr.msk.f32.gmra.mrb[30].mxu0 %vm1112_vm5, %v670_v52 }
 0x12d   : > { %v671_v59 = vmax.f32 %v633_v57, 0.0  ;;  %v2044_v60 = vpop.f32.mrb[12].mxu0  ;;  %v2741_v57 = vld [vmem:[%s2881_s7] ss:$0 sm:$0xff] }
 0x12e   : > { %v648_v61 = vadd.f32 %v2044_v60, %v1775_v23  ;;  %v642_v62 = vpop.f32.mrb[13].mxu0 }
 0x12f   : > { %v643_v63 = vadd.f32 %v1775_v23, %v642_v62  ;;  %2111 = vmatprep.mubr.msk.f32.mxu0 %vm1112_vm5, %v671_v59  ;;  %v1909_v7 = vpop.f32.mrb[0].mxu1 }
 0x130   : > { %v674_v0 = vmax.f32 %v648_v61, 0.0  ;;  %2112 = vmatmul.mubr.msk.f32.gmra.mrb[32].mxu0 %vm1112_vm5, %v672_v58  ;;  %v1910_v10 = vpop.f32.mrb[1].mxu1 }
 0x131   : > { %v673_v1 = vmax.f32 %v643_v63, 0.0  ;;  %v2047_v2 = vpop.f32.mrb[14].mxu0  ;;  %v1911_v12 = vadd.f32 %v1910_v10, %v1909_v7 }
 0x132   : > { %v658_v3 = vadd.f32 %v2047_v2, %v1775_v23  ;;  %v652_v4 = vpop.f32.mrb[15].mxu0 }
 0x133   : > { %v653_v5 = vadd.f32 %v1775_v23, %v652_v4  ;;  %2114 = vmatprep.mubr.msk.f32.mxu0 %vm1112_vm5, %v673_v1  ;;  %v1912_v14 = vpop.f32.mrb[2].mxu1 }
 0x134   : > { %v676_v6 = vmax.f32 %v658_v3, 0.0  ;;  %2115 = vmatmul.mubr.msk.f32.gmra.mrb[34].mxu0 %vm1112_vm5, %v674_v0  ;;  %v1913_v16 = vpop.f32.mrb[3].mxu1 }
 0x135   : > { %v675_v8 = vmax.f32 %v653_v5, 0.0  ;;  %v1900_v9 = vpop.f32.mrb[16].mxu0  ;;  %v1914_v18 = vadd.f32 %v1913_v16, %v1912_v14 }
 0x136   : > { %v1901_v11 = vpop.f32.mrb[17].mxu0 }
 0x137   : > { %2117 = vmatprep.mubr.msk.f32.mxu0 %vm1112_vm5, %v675_v8  ;;  %v1902_v13 = vadd.f32 %v1901_v11, %v1900_v9  ;;  %v1915_v20 = vpop.f32.mrb[4].mxu1 }
 0x138   : > { %2118 = vmatmul.mubr.msk.f32.gmra.mrb[36].mxu0 %vm1112_vm5, %v676_v6  ;;  %v1916_v22 = vpop.f32.mrb[5].mxu1 }
 0x139   : > { %v1903_v15 = vpop.f32.mrb[18].mxu0  ;;  %v1917_v24 = vadd.f32 %v1916_v22, %v1915_v20 }
 0x13a   : > { %v1904_v17 = vpop.f32.mrb[19].mxu0 }
 0x13b   : > { %v1905_v19 = vadd.f32 %v1904_v17, %v1903_v15  ;;  %v1918_v26 = vpop.f32.mrb[6].mxu1 }
 0x13c   : > { %v1919_v27 = vpop.f32.mrb[7].mxu1 }
 0x13d   : > { %v1906_v21 = vpop.f32.mrb[20].mxu0  ;;  %v1920_v28 = vadd.f32 %v1919_v27, %v1918_v26 }
 0x13e   : > { %v1907_v23 = vpop.f32.mrb[21].mxu0 }
 0x13f   : > { %v1908_v25 = vadd.f32 %v1907_v23, %v1906_v21  ;;  %v1921_v29 = vpop.f32.mrb[8].mxu1 }
 0x140   : > { %v1922_v30 = vpop.f32.mrb[9].mxu1 }
 0x141   : > { %v1923_v31 = vadd.f32 %v1922_v30, %v1921_v29 }
 0x143   : > { %v1924_v32 = vpop.f32.mrb[10].mxu1 }
 0x144   : > { %v1925_v33 = vpop.f32.mrb[11].mxu1 }
 0x145   : > { %v2726_v34 = vadd.f32 %v1925_v33, %v1924_v32 }
 0x147   : > { %v1927_v35 = vpop.f32.mrb[12].mxu1 }
 0x148   : > { %v1928_v36 = vpop.f32.mrb[13].mxu1 }
 0x149   : > { %v1929_v37 = vadd.f32 %v1928_v36, %v1927_v35 }
 0x14b   : > { %v1930_v38 = vpop.f32.mrb[14].mxu1 }
 0x14c   : > { %v1931_v39 = vpop.f32.mrb[15].mxu1 }
 0x14d   : > { %v2728_v40 = vadd.f32 %v1931_v39, %v1930_v38 }
 0x14f   : > { %v1933_v41 = vpop.f32.mrb[16].mxu1 }
 0x150   : > { %v1934_v42 = vpop.f32.mrb[17].mxu1 }
 0x151   : > { %v1935_v43 = vadd.f32 %v1934_v42, %v1933_v41 }
 0x153   : > { %v1936_v44 = vpop.f32.mrb[18].mxu1 }
 0x154   : > { %v1937_v45 = vpop.f32.mrb[19].mxu1 }
 0x155   : > { %v2730_v46 = vadd.f32 %v1937_v45, %v1936_v44 }
 0x157   : > { %v1939_v47 = vpop.f32.mrb[20].mxu1 }
 0x158   : > { %v1940_v48 = vpop.f32.mrb[21].mxu1 }
 0x159   : > { %v2732_v49 = vadd.f32 %v1940_v48, %v1939_v47 }
 0x15b   : > { %v1942_v50 = vpop.f32.mrb[22].mxu1 }
 0x15c   : > { %v1943_v51 = vpop.f32.mrb[23].mxu1 }
 0x15d   : > { %v2734_v53 = vadd.f32 %v1943_v51, %v1942_v50 }
 0x15f   : > { %v1945_v52 = vpop.f32.mrb[24].mxu1 }
 0x160   : > { %v1946_v54 = vpop.f32.mrb[25].mxu1 }
 0x161   : > { %v2736_v55 = vadd.f32 %v1946_v54, %v1945_v52 }
 0x1ef   : > { %v2098_v56 = vpop.f32.mrb[22].mxu0 }
 0x1f0   : > { %v2258_v58 = vadd.f32 %v2098_v56, %v1905_v19  ;;  %v1227_v59 = vpop.f32.mrb[23].mxu0 }
 0x1f1   : > { %v2259_v60 = vadd.f32 %v1902_v13, %v1227_v59 }
 0x1f2   : > { %v1314_v61 = vadd.f32 %v2258_v58, %v2741_v57 }
 0x1f3   : > { %v1313_v62 = vadd.f32 %v2259_v60, %v2741_v57  ;;  %v2101_v63 = vpop.f32.mrb[24].mxu0 }
 0x1f4   : > { %v2260_v0 = vadd.f32 %v2101_v63, %v1911_v12  ;;  %v1237_v1 = vpop.f32.mrb[25].mxu0  ;;  %v1330_v4 = vmax.f32 %v1314_v61, 0.0 }
 0x1f5   : > { %v1329_v2 = vmax.f32 %v1313_v62, 0.0  ;;  %v2261_v3 = vadd.f32 %v1908_v25, %v1237_v1  ;;  %v2791_v62 = vld [vmem:[%s2884_s10] ss:$0 sm:$0xff] }
 0x1f6   : > { %v1316_v5 = vadd.f32 %v2260_v0, %v2741_v57 }
 0x1f7   : > { %v1315_v6 = vadd.f32 %v2261_v3, %v2741_v57  ;;  %v2104_v7 = vpop.f32.mrb[26].mxu0  ;;  %2136 = vmatprep.mubr.msk.f32.mxu1 %vm1360_vm6, %v1329_v2 }
 0x1f8   : > { %v2262_v8 = vadd.f32 %v2104_v7, %v1917_v24  ;;  %v1247_v9 = vpop.f32.mrb[27].mxu0  ;;  %2137 = vmatmul.mubr.msk.f32.vlgmr.msra.gmra.mrb[26].mxu1 %vm1360_vm6, %v1330_v4  ;;  %v1332_v13 = vmax.f32 %v1316_v5, 0.0 }
 0x1f9   : > { %v1331_v10 = vmax.f32 %v1315_v6, 0.0  ;;  %v2263_v11 = vadd.f32 %v1914_v18, %v1247_v9 }
 0x1fa   : > { %v1318_v12 = vadd.f32 %v2262_v8, %v2741_v57 }
 0x1fb   : > { %v1317_v14 = vadd.f32 %v2263_v11, %v2741_v57  ;;  %v2107_v15 = vpop.f32.mrb[28].mxu0  ;;  %2139 = vmatprep.mubr.msk.f32.mxu1 %vm1360_vm6, %v1331_v10 }
 0x1fc   : > { %v2264_v16 = vadd.f32 %v2107_v15, %v1923_v31  ;;  %v1257_v17 = vpop.f32.mrb[29].mxu0  ;;  %2140 = vmatmul.mubr.msk.f32.gmra.mrb[28].mxu1 %vm1360_vm6, %v1332_v13  ;;  %v1334_v21 = vmax.f32 %v1318_v12, 0.0 }
 0x1fd   : > { %v1333_v19 = vmax.f32 %v1317_v14, 0.0  ;;  %v2265_v20 = vadd.f32 %v1920_v28, %v1257_v17 }
 0x1fe   : > { %v1320_v22 = vadd.f32 %v2264_v16, %v2741_v57 }
 0x1ff   : > { %v1319_v23 = vadd.f32 %v2265_v20, %v2741_v57  ;;  %v2110_v18 = vpop.f32.mrb[30].mxu0  ;;  %2142 = vmatprep.mubr.msk.f32.mxu1 %vm1360_vm6, %v1333_v19 }
 0x200   : > { %v2266_v24 = vadd.f32 %v2110_v18, %v1929_v37  ;;  %v1267_v25 = vpop.f32.mrb[31].mxu0  ;;  %2143 = vmatmul.mubr.msk.f32.gmra.mrb[30].mxu1 %vm1360_vm6, %v1334_v21  ;;  %v1336_v29 = vmax.f32 %v1320_v22, 0.0 }
 0x201   : > { %v1335_v26 = vmax.f32 %v1319_v23, 0.0  ;;  %v2267_v27 = vadd.f32 %v2726_v34, %v1267_v25 }
 0x202   : > { %v1322_v30 = vadd.f32 %v2266_v24, %v2741_v57 }
 0x203   : > { %v1321_v28 = vadd.f32 %v2267_v27, %v2741_v57  ;;  %v2113_v31 = vpop.f32.mrb[32].mxu0  ;;  %2145 = vmatprep.mubr.msk.f32.mxu1 %vm1360_vm6, %v1335_v26 }
 0x204   : > { %v2268_v32 = vadd.f32 %v2113_v31, %v1935_v43  ;;  %v1277_v33 = vpop.f32.mrb[33].mxu0  ;;  %2146 = vmatmul.mubr.msk.f32.gmra.mrb[32].mxu1 %vm1360_vm6, %v1336_v29  ;;  %v1338_v37 = vmax.f32 %v1322_v30, 0.0 }
 0x205   : > { %v1337_v35 = vmax.f32 %v1321_v28, 0.0  ;;  %v2269_v36 = vadd.f32 %v2728_v40, %v1277_v33 }
 0x206   : > { %v1324_v38 = vadd.f32 %v2268_v32, %v2741_v57 }
 0x207   : > { %v1323_v34 = vadd.f32 %v2269_v36, %v2741_v57  ;;  %v2116_v39 = vpop.f32.mrb[34].mxu0  ;;  %2148 = vmatprep.mubr.msk.f32.mxu1 %vm1360_vm6, %v1337_v35 }
 0x208   : > { %v2270_v41 = vadd.f32 %v2116_v39, %v2732_v49  ;;  %v1287_v42 = vpop.f32.mrb[35].mxu0  ;;  %2149 = vmatmul.mubr.msk.f32.gmra.mrb[34].mxu1 %vm1360_vm6, %v1338_v37  ;;  %v1340_v45 = vmax.f32 %v1324_v38, 0.0 }
 0x209   : > { %v1339_v43 = vmax.f32 %v1323_v34, 0.0  ;;  %v2271_v44 = vadd.f32 %v2730_v46, %v1287_v42 }
 0x20a   : > { %v1326_v47 = vadd.f32 %v2270_v41, %v2741_v57 }
 0x20b   : > { %v1325_v40 = vadd.f32 %v2271_v44, %v2741_v57  ;;  %v2119_v48 = vpop.f32.mrb[36].mxu0  ;;  %2151 = vmatprep.mubr.msk.f32.mxu1 %vm1360_vm6, %v1339_v43 }
 0x20c   : > { %v2272_v50 = vadd.f32 %v2119_v48, %v2736_v55  ;;  %v1297_v51 = vpop.f32.mrb[37].mxu0  ;;  %2152 = vmatmul.mubr.msk.f32.gmra.mrb[36].mxu1 %vm1360_vm6, %v1340_v45  ;;  %v1342_v54 = vmax.f32 %v1326_v47, 0.0  ;;  %v2784_v55 = vld [vmem:[%s2883_s9] ss:$0 sm:$0xff] }
 0x20d   : > { %v1341_v49 = vmax.f32 %v1325_v40, 0.0  ;;  %v2273_v52 = vadd.f32 %v2734_v53, %v1297_v51 }
 0x20e   : > { %v1328_v56 = vadd.f32 %v2272_v50, %v2741_v57 }
 0x20f   : > { %v1327_v46 = vadd.f32 %v2273_v52, %v2741_v57  ;;  %2154 = vmatprep.mubr.msk.f32.mxu1 %vm1360_vm6, %v1341_v49 }
 0x210   : > { %2155 = vmatmul.mubr.msk.f32.gmra.mrb[38].mxu1 %vm1360_vm6, %v1342_v54  ;;  %v1344_v59 = vmax.f32 %v1328_v56, 0.0 }
 0x211   : > { %v1343_v58 = vmax.f32 %v1327_v46, 0.0 }
 0x213   : > { %2157 = vmatprep.mubr.msk.f32.mxu1 %vm1360_vm6, %v1343_v58 }
 0x214   : > { %2158 = vmatmul.mubr.msk.f32.gmra.mrb[40].mxu1 %vm1360_vm6, %v1344_v59 }
 0x2cb   : > { %v2138_v53 = vpop.f32.mrb[26].mxu1 }
 0x2cc   : > { %v1481_v60 = vadd.f32 %v2138_v53, %v2784_v55  ;;  %v1475_v61 = vpop.f32.mrb[27].mxu1 }
 0x2cd   : > { %v1476_v57 = vadd.f32 %v2784_v55, %v1475_v61 }
 0x2ce   : > { %v1555_v63 = vmax.f32 %v1481_v60, 0.0 }
 0x2cf   : > { %v1554_v0 = vmax.f32 %v1476_v57, 0.0  ;;  %v2141_v1 = vpop.f32.mrb[28].mxu1 }
 0x2d0   : > { %v1491_v2 = vadd.f32 %v2141_v1, %v2784_v55  ;;  %v1485_v3 = vpop.f32.mrb[29].mxu1  ;;  %v1578_v4 = vmul.f32 %v2791_v62, %v1555_v63 }
 0x2d1   : > { %v1486_v5 = vadd.f32 %v2784_v55, %v1485_v3  ;;  %v1577_v8 = vmul.f32 %v2791_v62, %v1554_v0 }
 0x2d2   : > { %v1557_v6 = vmax.f32 %v1491_v2, 0.0  ;;  %v1596_v7 = vsel %vm467_vm0, %v1578_v4, 0.0 }
 0x2d3   : > { %v1556_v9 = vmax.f32 %v1486_v5, 0.0  ;;  %1597 = vadd.xlane.f32.xlu0 %v1596_v7  ;;  %v2144_v10 = vpop.f32.mrb[30].mxu1  ;;  %v1593_v17 = vsel %vm467_vm0, %v1577_v8, 0.0 }
 0x2d4   : > { %v1501_v11 = vadd.f32 %v2144_v10, %v2784_v55  ;;  %v1495_v13 = vpop.f32.mrb[31].mxu1  ;;  %v1580_v12 = vmul.f32 %v2791_v62, %v1557_v6 }
 0x2d5   : > { %v1496_v14 = vadd.f32 %v2784_v55, %v1495_v13  ;;  %v1579_v19 = vmul.f32 %v2791_v62, %v1556_v9  ;;  %v1844_v13 = vld [vmem:[#allocation6] ss:$0 sm:$0xff] }
 0x2d6   : > { %v1559_v15 = vmax.f32 %v1501_v11, 0.0  ;;  %v1602_v16 = vsel %vm467_vm0, %v1580_v12, 0.0 }
 0x2d7   : > { %v1558_v20 = vmax.f32 %v1496_v14, 0.0  ;;  %1603 = vadd.xlane.f32.xlu1 %v1602_v16  ;;  %v2147_v21 = vpop.f32.mrb[32].mxu1  ;;  %1594 = vadd.xlane.f32.xlu0 %v1593_v17  ;;  %v1599_v26 = vsel %vm467_vm0, %v1579_v19, 0.0 }
 0x2d8   : > { %v1511_v22 = vadd.f32 %v2147_v21, %v2784_v55  ;;  %v1505_v23 = vpop.f32.mrb[33].mxu1  ;;  %v1582_v27 = vmul.f32 %v2791_v62, %v1559_v15 }
 0x2d9   : > { %v1506_v18 = vadd.f32 %v2784_v55, %v1505_v23  ;;  %v1581_v24 = vmul.f32 %v2791_v62, %v1558_v20 }
 0x2da   : > { %v1561_v25 = vmax.f32 %v1511_v22, 0.0  ;;  %v1608_v37 = vsel %vm467_vm0, %v1582_v27, 0.0 }
 0x2db   : > { %v1560_v29 = vmax.f32 %v1506_v18, 0.0  ;;  %v2150_v30 = vpop.f32.mrb[34].mxu1  ;;  %1600 = vadd.xlane.f32.xlu1 %v1599_v26  ;;  %v1605_v28 = vsel %vm467_vm0, %v1581_v24, 0.0 }
 0x2dc   : > { %v1521_v31 = vadd.f32 %v2150_v30, %v2784_v55  ;;  %v1515_v32 = vpop.f32.mrb[35].mxu1  ;;  %1606 = vadd.xlane.f32.xlu0 %v1605_v28  ;;  %v1584_v38 = vmul.f32 %v2791_v62, %v1561_v25 }
 0x2dd   : > { %v1516_v33 = vadd.f32 %v2784_v55, %v1515_v32  ;;  %v1583_v35 = vmul.f32 %v2791_v62, %v1560_v29 }
 0x2de   : > { %v1563_v36 = vmax.f32 %v1521_v31, 0.0  ;;  %v1614_v40 = vsel %vm467_vm0, %v1584_v38, 0.0 }
 0x2df   : > { %v1562_v34 = vmax.f32 %v1516_v33, 0.0  ;;  %v2153_v39 = vpop.f32.mrb[36].mxu1  ;;  %1609 = vadd.xlane.f32.xlu1 %v1608_v37  ;;  %v1611_v41 = vsel %vm467_vm0, %v1583_v35, 0.0 }
 0x2e0   : > { %v1531_v42 = vadd.f32 %v2153_v39, %v2784_v55  ;;  %v1525_v43 = vpop.f32.mrb[37].mxu1  ;;  %1612 = vadd.xlane.f32.xlu0 %v1611_v41  ;;  %v1586_v48 = vmul.f32 %v2791_v62, %v1563_v36 }
 0x2e1   : > { %v1526_v44 = vadd.f32 %v2784_v55, %v1525_v43  ;;  %v1585_v45 = vmul.f32 %v2791_v62, %v1562_v34 }
 0x2e2   : > { %v1565_v47 = vmax.f32 %v1531_v42, 0.0  ;;  %v1620_v59 = vsel %vm467_vm0, %v1586_v48, 0.0 }
 0x2e3   : > { %v1564_v50 = vmax.f32 %v1526_v44, 0.0  ;;  %v2156_v51 = vpop.f32.mrb[38].mxu1  ;;  %1615 = vadd.xlane.f32.xlu1 %v1614_v40  ;;  %v1617_v49 = vsel %vm467_vm0, %v1585_v45, 0.0 }
 0x2e4   : > { %v1541_v52 = vadd.f32 %v2156_v51, %v2784_v55  ;;  %v1535_v54 = vpop.f32.mrb[39].mxu1  ;;  %1618 = vadd.xlane.f32.xlu0 %v1617_v49  ;;  %v1588_v53 = vmul.f32 %v2791_v62, %v1565_v47 }
 0x2e5   : > { %v1536_v56 = vadd.f32 %v2784_v55, %v1535_v54  ;;  %v1587_v46 = vmul.f32 %v2791_v62, %v1564_v50 }
 0x2e6   : > { %v1567_v58 = vmax.f32 %v1541_v52, 0.0  ;;  %v1626_v4 = vsel %vm467_vm0, %v1588_v53, 0.0 }
 0x2e7   : > { %v1566_v60 = vmax.f32 %v1536_v56, 0.0  ;;  %v2159_v61 = vpop.f32.mrb[40].mxu1  ;;  %1621 = vadd.xlane.f32.xlu1 %v1620_v59  ;;  %v1623_v57 = vsel %vm467_vm0, %v1587_v46, 0.0 }
 0x2e8   : > { %v1551_v63 = vadd.f32 %v2159_v61, %v2784_v55  ;;  %v1545_v0 = vpop.f32.mrb[41].mxu1  ;;  %1624 = vadd.xlane.f32.xlu0 %v1623_v57  ;;  %v1590_v5 = vmul.f32 %v2791_v62, %v1567_v58 }
 0x2e9   : > { %v1546_v1 = vadd.f32 %v2784_v55, %v1545_v0  ;;  %v1589_v2 = vmul.f32 %v2791_v62, %v1566_v60 }
 0x2ea   : > { %v1569_v3 = vmax.f32 %v1551_v63, 0.0  ;;  %v1632_v9 = vsel %vm467_vm0, %v1590_v5, 0.0 }
 0x2eb   : > { %v1568_v6 = vmax.f32 %v1546_v1, 0.0  ;;  %1627 = vadd.xlane.f32.xlu1 %v1626_v4  ;;  %v1629_v7 = vsel %vm467_vm0, %v1589_v2, 0.0 }
 0x2ec   : > { %1630 = vadd.xlane.f32.xlu0 %v1629_v7  ;;  %v1592_v55 = vmul.f32 %v2791_v62, %v1569_v3 }
 0x2ed   : > { %v1591_v8 = vmul.f32 %v2791_v62, %v1568_v6 }
 0x2ee   : > { %v1638_v11 = vsel %vm467_vm0, %v1592_v55, 0.0 }
 0x2ef   : > { %1633 = vadd.xlane.f32.xlu1 %v1632_v9  ;;  %v1635_v10 = vsel %vm467_vm0, %v1591_v8, 0.0 }
 0x2f0   : > { %1636 = vadd.xlane.f32.xlu0 %v1635_v10 }
 0x2f3   : > { %1639 = vadd.xlane.f32.xlu1 %v1638_v11 }
 0x360   : > { %v1598_v12 = vpop.xlane.xlu0 %1597 }
 0x361   : > { %v1649_v14 = vadd.f32 %v1844_v13, %v1598_v12 }
 0x363   : > { %1666 = vst.msk [vmem:[%s2441_s16 + $0x8] sm:$0xff] %vm1664_vm7, %v1649_v14 }
 0x364   : > { %v1604_v15 = vpop.xlane.xlu1 %1603  ;;  %v1595_v16 = vpop.xlane.xlu0 %1594 }
 0x365   : > { %v1651_v62 = vadd.f32 %v1844_v13, %v1604_v15  ;;  %v1648_v17 = vadd.f32 %v1844_v13, %v1595_v16 }
 0x367   : > { %1668 = vst.msk [vmem:[%s2441_s16 + $0x18] sm:$0xff] %vm1664_vm7, %v1651_v62  ;;  %1665 = vst.msk [vmem:[%s2441_s16] sm:$0xff] %vm1664_vm7, %v1648_v17 }
 0x368   : > { %v1601_v19 = vpop.xlane.xlu1 %1600 }
 0x369   : > { %v1650_v20 = vadd.f32 %v1844_v13, %v1601_v19  ;;  %v1607_v21 = vpop.xlane.xlu0 %1606 }
 0x36a   : > { %v1652_v22 = vadd.f32 %v1844_v13, %v1607_v21 }
 0x36b   : > { %1667 = vst.msk [vmem:[%s2441_s16 + $0x10] sm:$0xff] %vm1664_vm7, %v1650_v20 }
 0x36c   : > { %1669 = vst.msk [vmem:[%s2441_s16 + $0x20] sm:$0xff] %vm1664_vm7, %v1652_v22  ;;  %v1610_v23 = vpop.xlane.xlu1 %1609 }
 0x36d   : > { %v1653_v18 = vadd.f32 %v1844_v13, %v1610_v23  ;;  %v1613_v24 = vpop.xlane.xlu0 %1612 }
 0x36e   : > { %v1654_v25 = vadd.f32 %v1844_v13, %v1613_v24 }
 0x36f   : > { %1670 = vst.msk [vmem:[%s2441_s16 + $0x28] sm:$0xff] %vm1664_vm7, %v1653_v18 }
 0x370   : > { %1671 = vst.msk [vmem:[%s2441_s16 + $0x30] sm:$0xff] %vm1664_vm7, %v1654_v25  ;;  %v1616_v26 = vpop.xlane.xlu1 %1615 }
 0x371   : > { %v1655_v27 = vadd.f32 %v1844_v13, %v1616_v26  ;;  %v1619_v29 = vpop.xlane.xlu0 %1618 }
 0x372   : > { %v1656_v30 = vadd.f32 %v1844_v13, %v1619_v29 }
 0x373   : > { %1672 = vst.msk [vmem:[%s2441_s16 + $0x38] sm:$0xff] %vm1664_vm7, %v1655_v27 }
 0x374   : > { %1673 = vst.msk [vmem:[%s2441_s16 + $0x40] sm:$0xff] %vm1664_vm7, %v1656_v30  ;;  %v1622_v28 = vpop.xlane.xlu1 %1621 }
 0x375   : > { %v1657_v31 = vadd.f32 %v1844_v13, %v1622_v28  ;;  %v1625_v32 = vpop.xlane.xlu0 %1624 }
 0x376   : > { %v1658_v33 = vadd.f32 %v1844_v13, %v1625_v32 }
 0x377   : > { %1674 = vst.msk [vmem:[%s2441_s16 + $0x48] sm:$0xff] %vm1664_vm7, %v1657_v31 }
 0x378   : > { %1675 = vst.msk [vmem:[%s2441_s16 + $0x50] sm:$0xff] %vm1664_vm7, %v1658_v33  ;;  %v1628_v35 = vpop.xlane.xlu1 %1627 }
 0x379   : > { %v1659_v36 = vadd.f32 %v1844_v13, %v1628_v35  ;;  %v1631_v37 = vpop.xlane.xlu0 %1630 }
 0x37a   : > { %v1660_v38 = vadd.f32 %v1844_v13, %v1631_v37 }
 0x37b   : > { %1676 = vst.msk [vmem:[%s2441_s16 + $0x58] sm:$0xff] %vm1664_vm7, %v1659_v36 }
 0x37c   : > { %1677 = vst.msk [vmem:[%s2441_s16 + $0x60] sm:$0xff] %vm1664_vm7, %v1660_v38  ;;  %v1634_v34 = vpop.xlane.xlu1 %1633 }
 0x37d   : > { %v1661_v39 = vadd.f32 %v1844_v13, %v1634_v34  ;;  %v1637_v41 = vpop.xlane.xlu0 %1636 }
 0x37e   : > { %v1662_v42 = vadd.f32 %v1844_v13, %v1637_v41 }
 0x37f   : > { %1678 = vst.msk [vmem:[%s2441_s16 + $0x68] sm:$0xff] %vm1664_vm7, %v1661_v39 }
 0x380   : > { %1679 = vst.msk [vmem:[%s2441_s16 + $0x70] sm:$0xff] %vm1664_vm7, %v1662_v42  ;;  %v1640_v43 = vpop.xlane.xlu1 %1639 }
 0x381   : > { %v1663_v44 = vadd.f32 %v1844_v13, %v1640_v43 }
 0x383   : > { %1680 = vst.msk [vmem:[%s2441_s16 + $0x78] sm:$0xff] %vm1664_vm7, %v1663_v44 }
 0x384 PF: > { %s30_s28 = sadd.s32 1, %s2347_s28  }
 0x385   : > { %p27_p11 = scmp.ge.s32.totalorder %s30_s28, 4  }
 0x387   :  { %29 = sbr.rel (!%p27_p11) target bundleno = 16 (0x10), region = 168 }
 0x38e   :  { %1703 = vsyncmov [#allocation3] }
 0x391   :  { %s1704_s0 = vpop.sfrf %1703 }
 0x392   :  { %p1847_p12 = scmp.ne.s32.totalorder %s1704_s0, 0 }
 0x394   :  { %1708 = shalt.err (%p1847_p12)  }

</bundles_post_ra>
